<compile_context>
chip_gen: v5e
topology: v5e:2x2
jax: 0.10.0
libtpu: 0.0.40
codegen_flags: <defaults>
</compile_context>

<pallas_src>
import math

import jax
import jax.numpy as jnp
from jax.experimental import pallas as pl
from jax.experimental.pallas import tpu as pltpu


# ----------------------------------------------------------------------------
# helpers
# ----------------------------------------------------------------------------
def _round_up(x, m):
    return ((x + m - 1) // m) * m


def _pick_tile(dim, candidates=(512, 256, 128)):
    for t in candidates:
        if dim % t == 0:
            return t
    return dim


_VMEM_LIMIT = 48 * 1024 * 1024  # fits comfortably inside v7x's 64 MiB VMEM


# ----------------------------------------------------------------------------
# Kernel 1: backbone stand-in — FC projection, fused bias + F.normalize epilogue
#   out = F.normalize(x @ W + b)   (normalized embedding, bf16)
# ----------------------------------------------------------------------------
def backbone_fc_kernel(x_ref, w_ref, b_ref, o_ref, acc_ref):
    k = pl.program_id(1)

    @pl.when(k == 0)
    def _():
        acc_ref[...] = jnp.zeros_like(acc_ref)

    acc_ref[...] += jnp.dot(
        x_ref[...], w_ref[...], preferred_element_type=jnp.float32
    )

    @pl.when(k == pl.num_programs(1) - 1)
    def _():
        feat = acc_ref[...] + b_ref[...]                       # f32 epilogue
        ss = jnp.sum(feat * feat, axis=1, keepdims=True)
        inv = jax.lax.rsqrt(jnp.maximum(ss, 1e-24))            # 1/max(||f||,1e-12)
        o_ref[...] = (feat * inv).astype(o_ref.dtype)


def backbone_fc_normalized(x_flat, w, b, *, tm):
    n_pad, d_pad = x_flat.shape
    f_pad = w.shape[1]
    tk = _pick_tile(d_pad)
    grid = (n_pad // tm, d_pad // tk)

    cost = pl.CostEstimate(
        flops=2 * n_pad * d_pad * f_pad,
        transcendentals=n_pad,
        bytes_accessed=(n_pad * d_pad + d_pad * f_pad) * 2
        + f_pad * 4
        + n_pad * f_pad * 2,
    )

    return pl.pallas_call(
        backbone_fc_kernel,
        out_shape=jax.ShapeDtypeStruct((n_pad, f_pad), jnp.bfloat16),
        grid=grid,
        in_specs=[
            pl.BlockSpec((tm, tk), lambda i, k: (i, k)),
            pl.BlockSpec((tk, f_pad), lambda i, k: (k, 0)),
            pl.BlockSpec((1, f_pad), lambda i, k: (0, 0)),
        ],
        out_specs=pl.BlockSpec((tm, f_pad), lambda i, k: (i, 0)),
        scratch_shapes=[pltpu.VMEM((tm, f_pad), jnp.float32)],
        compiler_params=pltpu.CompilerParams(
            dimension_semantics=("parallel", "arbitrary"),
            vmem_limit_bytes=_VMEM_LIMIT,
        ),
        cost_estimate=cost,
    )(x_flat, w, b)


# ----------------------------------------------------------------------------
# Kernel 2: L2-normalize class-weight rows (hoisted; run once per forward)
# ----------------------------------------------------------------------------
def l2_normalize_rows_kernel(w_ref, o_ref):
    w = w_ref[...]
    ss = jnp.sum(w * w, axis=1, keepdims=True)
    o_ref[...] = (w * jax.lax.rsqrt(jnp.maximum(ss, 1e-24))).astype(o_ref.dtype)


def l2_normalize_rows(w_classes):
    c_pad, f_pad = w_classes.shape
    tr = _pick_tile(c_pad)
    return pl.pallas_call(
        l2_normalize_rows_kernel,
        out_shape=jax.ShapeDtypeStruct((c_pad, f_pad), jnp.bfloat16),
        grid=(c_pad // tr,),
        in_specs=[pl.BlockSpec((tr, f_pad), lambda i: (i, 0))],
        out_specs=pl.BlockSpec((tr, f_pad), lambda i: (i, 0)),
        compiler_params=pltpu.CompilerParams(
            dimension_semantics=("parallel",),
            vmem_limit_bytes=_VMEM_LIMIT,
        ),
    )(w_classes)


# ----------------------------------------------------------------------------
# Kernel 3: ArcFace margin header on normalized embeddings
#   cosine = feat_n @ W_n.T ; margin at label class ; scaled by s
# ----------------------------------------------------------------------------
_S = 64.0
_M = 0.5
_COS_M = math.cos(_M)
_SIN_M = math.sin(_M)
_TH = math.cos(math.pi - _M)
_MM = math.sin(math.pi - _M) * _M


def arcface_header_kernel(feat_ref, wt_ref, label_ref, o_ref):
    # feat_ref is already F.normalize(features) (re-normalizing would be a no-op).
    cosine = jnp.dot(
        feat_ref[...], wt_ref[...], preferred_element_type=jnp.float32
    )  # (tm, tn_c) f32
    sine = jnp.sqrt(jnp.clip(1.0 - cosine * cosine, 0.0, 1.0))
    phi = cosine * _COS_M - sine * _SIN_M
    phi = jnp.where(cosine > _TH, phi, cosine - _MM)

    tn_c = o_ref.shape[1]
    class_base = pl.program_id(1) * tn_c
    classes = jax.lax.broadcasted_iota(jnp.int32, cosine.shape, 1) + class_base
    one_hot = classes == label_ref[...]                      # (tm,1) broadcast

    o_ref[...] = jnp.where(one_hot, phi, cosine) * _S


def arcface_header(feat_n, w_n_t, labels2d, *, tm):
    n_pad, f_pad = feat_n.shape
    c_pad = w_n_t.shape[1]
    tn_c = _pick_tile(c_pad)
    grid = (n_pad // tm, c_pad // tn_c)

    cost = pl.CostEstimate(
        flops=2 * n_pad * f_pad * c_pad + 8 * n_pad * c_pad,
        transcendentals=n_pad * c_pad,
        bytes_accessed=n_pad * f_pad * 2
        + f_pad * c_pad * 2
        + n_pad * 4
        + n_pad * c_pad * 4,
    )

    return pl.pallas_call(
        arcface_header_kernel,
        out_shape=jax.ShapeDtypeStruct((n_pad, c_pad), jnp.float32),
        grid=grid,
        in_specs=[
            pl.BlockSpec((tm, f_pad), lambda i, j: (i, 0)),
            pl.BlockSpec((f_pad, tn_c), lambda i, j: (0, j)),
            pl.BlockSpec((tm, 1), lambda i, j: (i, 0)),
        ],
        out_specs=pl.BlockSpec((tm, tn_c), lambda i, j: (i, j)),
        compiler_params=pltpu.CompilerParams(
            dimension_semantics=("parallel", "parallel"),
            vmem_limit_bytes=_VMEM_LIMIT,
        ),
        cost_estimate=cost,
    )(feat_n, w_n_t, labels2d)


# ----------------------------------------------------------------------------
# SoftmaxNet.forward(img, label) -> thetas
# ----------------------------------------------------------------------------
def softmaxnet_forward(img, label, params):
    n = img.shape[0]
    w_backbone = params["w_backbone"]       # (D, F)
    b_backbone = params["b_backbone"]       # (1, F)
    w_classes = params["w_classes"]         # (C, F)
    d, f = w_backbone.shape
    c = w_classes.shape[0]

    # --- padding (glue): lane dims -> multiples of 128, batch -> multiple of 16 ---
    if n <= 128:
        n_pad = _round_up(n, 16)
        tm = n_pad
    else:
        n_pad = _round_up(n, 128)
        tm = 128
    d_pad = _round_up(d, 128)
    f_pad = _round_up(f, 128)
    c_pad = _round_up(c, 128)

    x_flat = img.reshape(n, -1).astype(jnp.float32)
    x_p = jnp.pad(x_flat, ((0, n_pad - n), (0, d_pad - d))).astype(jnp.bfloat16)
    w_b = jnp.pad(w_backbone.astype(jnp.float32),
                  ((0, d_pad - d), (0, f_pad - f))).astype(jnp.bfloat16)
    b_b = jnp.pad(b_backbone.astype(jnp.float32), ((0, 0), (0, f_pad - f)))
    w_c = jnp.pad(w_classes.astype(jnp.float32),
                  ((0, c_pad - c), (0, f_pad - f)))
    labels_p = jnp.full((n_pad, 1), -1, dtype=jnp.int32)
    labels_p = labels_p.at[:n, 0].set(label.astype(jnp.int32))

    # --- backbone FC + fused F.normalize (bf16 normalized embeddings) ---
    feat_n = backbone_fc_normalized(x_p, w_b, b_b, tm=tm)

    # --- hoisted, once-per-forward class-weight normalization; pre-transposed ---
    w_n = l2_normalize_rows(w_c)            # (C_pad, F_pad) bf16
    w_n_t = w_n.T                            # (F_pad, C_pad) — glue transpose, done once

    # --- ArcFace margin header ---
    thetas_full = arcface_header(feat_n, w_n_t, labels_p, tm=tm)

    # drop padded batch rows / class columns (keeps downstream softmax clean)
    return thetas_full[:n, :c]


if __name__ == "__main__":
    # Small shapes consistent with the module: img (N, C, H, W)
    N, C, H, W = 2, 4, 16, 16
    NUM_FEATURES = 32
    NUM_CLASSES = 8

    key = jax.random.PRNGKey(0)
    k_img, k_wb, k_bb, k_wc, k_lbl = jax.random.split(key, 5)

    img = jax.random.normal(k_img, (N, C, H, W), dtype=jnp.float32)
    label = jax.random.randint(k_lbl, (N,), 0, NUM_CLASSES, dtype=jnp.int32)

    params = {
        "w_backbone": jax.random.normal(
            k_wb, (C * H * W, NUM_FEATURES), dtype=jnp.float32
        ) * 0.02,
        "b_backbone": jax.random.normal(
            k_bb, (1, NUM_FEATURES), dtype=jnp.float32
        ) * 0.01,
        "w_classes": jax.random.normal(
            k_wc, (NUM_CLASSES, NUM_FEATURES), dtype=jnp.float32
        ) * 0.1,
    }

    thetas = jax.jit(softmaxnet_forward)(img, label, params)
    jax.block_until_ready(thetas)
    assert thetas.shape == (N, NUM_CLASSES)
    assert bool(jnp.all(jnp.isfinite(thetas)))
    print("KERNEL_OK")
</pallas_src>

<mosaic_0001>
module attributes {stable_mosaic.version = 11 : i64} {
  func.func @l2_normalize_rows_kernel(%arg0: i32, %arg1: memref<128x128xf32, #tpu.memory_space<vmem>>, %arg2: memref<128x128xbf16, #tpu.memory_space<vmem>>) attributes {dimension_semantics = [#tpu.dimension_semantics<parallel>], iteration_bounds = array<i64: 1>, scalar_prefetch = 0 : i64, scratch_operands = 0 : i64, tpu.core_type = #tpu.core_type<tc>, window_params = [{transform_indices = @transform_0, window_bounds = array<i64: 128, 128>}, {transform_indices = @transform_1, window_bounds = array<i64: 128, 128>}]} {
    %c0 = arith.constant 0 : index
    %c0_0 = arith.constant 0 : index
    %0 = vector.load %arg1[%c0, %c0_0] : memref<128x128xf32, #tpu.memory_space<vmem>>, vector<128x128xf32>
    %1 = arith.mulf %0, %0 : vector<128x128xf32>
    %cst = arith.constant dense<0.000000e+00> : vector<128xf32>
    %2 = vector.multi_reduction <add>, %1, %cst [1] : vector<128x128xf32> to vector<128xf32>
    %3 = vector.shape_cast %2 : vector<128xf32> to vector<128x1xf32>
    %cst_1 = arith.constant 1.000000e-24 : f32
    %4 = vector.broadcast %cst_1 : f32 to vector<128x1xf32>
    %5 = arith.maximumf %3, %4 : vector<128x1xf32>
    %6 = math.rsqrt %5 : vector<128x1xf32>
    %7 = vector.broadcast %6 : vector<128x1xf32> to vector<128x128xf32>
    %8 = arith.mulf %0, %7 : vector<128x128xf32>
    %9 = arith.truncf %8 : vector<128x128xf32> to vector<128x128xbf16>
    %c0_2 = arith.constant 0 : index
    %c0_3 = arith.constant 0 : index
    %10 = vector.load %arg2[%c0_2, %c0_3] : memref<128x128xbf16, #tpu.memory_space<vmem>>, vector<128x128xbf16>
    tpu.vector_store %arg2[%c0_2, %c0_3], %9 {strides = array<i32>} : memref<128x128xbf16, #tpu.memory_space<vmem>>, vector<128x128xbf16>,
    return
  }
  func.func @transform_0(%arg0: i32) -> (i32, i32) {
    %c0_i32 = arith.constant 0 : i32
    %c0_i32_0 = arith.constant 0 : i32
    return %arg0, %c0_i32 : i32, i32
  }
  func.func @transform_1(%arg0: i32) -> (i32, i32) {
    %c0_i32 = arith.constant 0 : i32
    %c0_i32_0 = arith.constant 0 : i32
    return %arg0, %c0_i32 : i32, i32
  }
}

module attributes {stable_mosaic.version = 11 : i64} {
  func.func @backbone_fc_kernel(%arg0: i32, %arg1: i32, %arg2: memref<16x512xbf16, #tpu.memory_space<vmem>>, %arg3: memref<512x128xbf16, #tpu.memory_space<vmem>>, %arg4: memref<1x128xf32, #tpu.memory_space<vmem>>, %arg5: memref<16x128xbf16, #tpu.memory_space<vmem>>, %arg6: memref<16x128xf32, #tpu.memory_space<vmem>>) attributes {dimension_semantics = [#tpu.dimension_semantics<parallel>, #tpu.dimension_semantics<arbitrary>], iteration_bounds = array<i64: 1, 2>, scalar_prefetch = 0 : i64, scratch_operands = 1 : i64, tpu.core_type = #tpu.core_type<tc>, window_params = [{transform_indices = @transform_0, window_bounds = array<i64: 16, 512>}, {transform_indices = @transform_1, window_bounds = array<i64: 512, 128>}, {pipeline_mode = #tpu.pipeline_mode<synchronous>, transform_indices = @transform_2, window_bounds = array<i64: 1, 128>}, {transform_indices = @transform_3, window_bounds = array<i64: 16, 128>}]} {
    %c0_i32 = arith.constant 0 : i32
    %0 = arith.cmpi eq, %arg1, %c0_i32 : i32
    %1 = arith.extui %0 : i1 to i32
    %c0_i32_0 = arith.constant 0 : i32
    %2 = arith.cmpi ne, %1, %c0_i32_0 : i32
    scf.if %2 {
      %cst_9 = arith.constant 0.000000e+00 : f32
      %12 = vector.broadcast %cst_9 : f32 to vector<16x128xf32>
      %c0_10 = arith.constant 0 : index
      %c0_11 = arith.constant 0 : index
      %13 = vector.load %arg6[%c0_10, %c0_11] : memref<16x128xf32, #tpu.memory_space<vmem>>, vector<16x128xf32>
      tpu.vector_store %arg6[%c0_10, %c0_11], %12 {strides = array<i32>} : memref<16x128xf32, #tpu.memory_space<vmem>>, vector<16x128xf32>,
    } else {
    }
    %c0 = arith.constant 0 : index
    %c0_1 = arith.constant 0 : index
    %3 = vector.load %arg6[%c0, %c0_1] : memref<16x128xf32, #tpu.memory_space<vmem>>, vector<16x128xf32>
    %c0_2 = arith.constant 0 : index
    %c0_3 = arith.constant 0 : index
    %4 = vector.load %arg2[%c0_2, %c0_3] : memref<16x512xbf16, #tpu.memory_space<vmem>>, vector<16x512xbf16>
    %c0_4 = arith.constant 0 : index
    %c0_5 = arith.constant 0 : index
    %5 = vector.load %arg3[%c0_4, %c0_5] : memref<512x128xbf16, #tpu.memory_space<vmem>>, vector<512x128xbf16>
    %cst = arith.constant dense<0.000000e+00> : vector<16x128xf32>
    %6 = tpu.matmul %4, %5, %cst {dimension_numbers = #tpu.dot_dimension_numbers<[1], [0], [0], [1], [0, 0, 1, 1], [], []>} : vector<16x512xbf16>, vector<512x128xbf16>, vector<16x128xf32> -> vector<16x128xf32>
    %7 = arith.addf %3, %6 : vector<16x128xf32>
    %c0_6 = arith.constant 0 : index
    %c0_7 = arith.constant 0 : index
    %8 = vector.load %arg6[%c0_6, %c0_7] : memref<16x128xf32, #tpu.memory_space<vmem>>, vector<16x128xf32>
    tpu.vector_store %arg6[%c0_6, %c0_7], %7 {strides = array<i32>} : memref<16x128xf32, #tpu.memory_space<vmem>>, vector<16x128xf32>,
    %c1_i32 = arith.constant 1 : i32
    %9 = arith.cmpi eq, %arg1, %c1_i32 : i32
    %10 = arith.extui %9 : i1 to i32
    %c0_i32_8 = arith.constant 0 : i32
    %11 = arith.cmpi ne, %10, %c0_i32_8 : i32
    scf.if %11 {
      %c0_9 = arith.constant 0 : index
      %c0_10 = arith.constant 0 : index
      %12 = vector.load %arg6[%c0_9, %c0_10] : memref<16x128xf32, #tpu.memory_space<vmem>>, vector<16x128xf32>
      %c0_11 = arith.constant 0 : index
      %c0_12 = arith.constant 0 : index
      %13 = vector.load %arg4[%c0_11, %c0_12] : memref<1x128xf32, #tpu.memory_space<vmem>>, vector<1x128xf32>
      %14 = vector.broadcast %13 : vector<1x128xf32> to vector<16x128xf32>
      %15 = arith.addf %12, %14 : vector<16x128xf32>
      %16 = arith.mulf %15, %15 : vector<16x128xf32>
      %cst_13 = arith.constant dense<0.000000e+00> : vector<16xf32>
      %17 = vector.multi_reduction <add>, %16, %cst_13 [1] : vector<16x128xf32> to vector<16xf32>
      %18 = vector.shape_cast %17 : vector<16xf32> to vector<16x1xf32>
      %cst_14 = arith.constant 1.000000e-24 : f32
      %19 = vector.broadcast %cst_14 : f32 to vector<16x1xf32>
      %20 = arith.maximumf %18, %19 : vector<16x1xf32>
      %21 = math.rsqrt %20 : vector<16x1xf32>
      %22 = vector.broadcast %21 : vector<16x1xf32> to vector<16x128xf32>
      %23 = arith.mulf %15, %22 : vector<16x128xf32>
      %24 = arith.truncf %23 : vector<16x128xf32> to vector<16x128xbf16>
      %c0_15 = arith.constant 0 : index
      %c0_16 = arith.constant 0 : index
      %25 = vector.load %arg5[%c0_15, %c0_16] : memref<16x128xbf16, #tpu.memory_space<vmem>>, vector<16x128xbf16>
      tpu.vector_store %arg5[%c0_15, %c0_16], %24 {strides = array<i32>} : memref<16x128xbf16, #tpu.memory_space<vmem>>, vector<16x128xbf16>,
    } else {
    }
    return
  }
  func.func @transform_0(%arg0: i32, %arg1: i32) -> (i32, i32) {
    %c0_i32 = arith.constant 0 : i32
    return %arg0, %arg1 : i32, i32
  }
  func.func @transform_1(%arg0: i32, %arg1: i32) -> (i32, i32) {
    %c0_i32 = arith.constant 0 : i32
    %c0_i32_0 = arith.constant 0 : i32
    return %arg1, %c0_i32 : i32, i32
  }
  func.func @transform_2(%arg0: i32, %arg1: i32) -> (i32, i32) {
    %c0_i32 = arith.constant 0 : i32
    %c0_i32_0 = arith.constant 0 : i32
    %c0_i32_1 = arith.constant 0 : i32
    return %c0_i32, %c0_i32_0 : i32, i32
  }
  func.func @transform_3(%arg0: i32, %arg1: i32) -> (i32, i32) {
    %c0_i32 = arith.constant 0 : i32
    %c0_i32_0 = arith.constant 0 : i32
    return %arg0, %c0_i32 : i32, i32
  }
}

module attributes {stable_mosaic.version = 11 : i64} {
  func.func @arcface_header_kernel(%arg0: i32, %arg1: i32, %arg2: memref<16x128xbf16, #tpu.memory_space<vmem>>, %arg3: memref<128x128xbf16, #tpu.memory_space<vmem>>, %arg4: memref<16x1xi32, #tpu.memory_space<vmem>>, %arg5: memref<16x128xf32, #tpu.memory_space<vmem>>) attributes {dimension_semantics = [#tpu.dimension_semantics<parallel>, #tpu.dimension_semantics<parallel>], iteration_bounds = array<i64: 1, 1>, scalar_prefetch = 0 : i64, scratch_operands = 0 : i64, tpu.core_type = #tpu.core_type<tc>, window_params = [{transform_indices = @transform_0, window_bounds = array<i64: 16, 128>}, {transform_indices = @transform_1, window_bounds = array<i64: 128, 128>}, {transform_indices = @transform_2, window_bounds = array<i64: 16, 1>}, {transform_indices = @transform_3, window_bounds = array<i64: 16, 128>}]} {
    %c0 = arith.constant 0 : index
    %c0_0 = arith.constant 0 : index
    %0 = vector.load %arg2[%c0, %c0_0] : memref<16x128xbf16, #tpu.memory_space<vmem>>, vector<16x128xbf16>
    %c0_1 = arith.constant 0 : index
    %c0_2 = arith.constant 0 : index
    %1 = vector.load %arg3[%c0_1, %c0_2] : memref<128x128xbf16, #tpu.memory_space<vmem>>, vector<128x128xbf16>
    %cst = arith.constant dense<0.000000e+00> : vector<16x128xf32>
    %2 = tpu.matmul %0, %1, %cst {dimension_numbers = #tpu.dot_dimension_numbers<[1], [0], [0], [1], [0, 0, 1, 1], [], []>} : vector<16x128xbf16>, vector<128x128xbf16>, vector<16x128xf32> -> vector<16x128xf32>
    %3 = arith.mulf %2, %2 : vector<16x128xf32>
    %cst_3 = arith.constant 1.000000e+00 : f32
    %4 = vector.broadcast %cst_3 : f32 to vector<16x128xf32>
    %5 = arith.subf %4, %3 : vector<16x128xf32>
    %cst_4 = arith.constant 0.000000e+00 : f32
    %cst_5 = arith.constant 1.000000e+00 : f32
    %6 = vector.broadcast %cst_4 : f32 to vector<16x128xf32>
    %7 = arith.maximumf %6, %5 : vector<16x128xf32>
    %8 = vector.broadcast %cst_5 : f32 to vector<16x128xf32>
    %9 = arith.minimumf %8, %7 : vector<16x128xf32>
    %10 = math.sqrt %9 : vector<16x128xf32>
    %cst_6 = arith.constant 0.87758255 : f32
    %11 = vector.broadcast %cst_6 : f32 to vector<16x128xf32>
    %12 = arith.mulf %2, %11 : vector<16x128xf32>
    %cst_7 = arith.constant 0.47942555 : f32
    %13 = vector.broadcast %cst_7 : f32 to vector<16x128xf32>
    %14 = arith.mulf %10, %13 : vector<16x128xf32>
    %15 = arith.subf %12, %14 : vector<16x128xf32>
    %cst_8 = arith.constant -0.87758255 : f32
    %16 = vector.broadcast %cst_8 : f32 to vector<16x128xf32>
    %17 = arith.cmpf ogt, %2, %16 : vector<16x128xf32>
    %cst_9 = arith.constant 0.239712775 : f32
    %18 = vector.broadcast %cst_9 : f32 to vector<16x128xf32>
    %19 = arith.subf %2, %18 : vector<16x128xf32>
    %20 = arith.select %17, %15, %19 : vector<16x128xi1>, vector<16x128xf32>
    %c128_i32 = arith.constant 128 : i32
    %21 = arith.muli %arg1, %c128_i32 : i32
    %22 = tpu.iota {dimensions = array<i32: 1>} : vector<16x128xi32>
    %23 = vector.broadcast %21 : i32 to vector<16x128xi32>
    %24 = arith.addi %22, %23 : vector<16x128xi32>
    %c0_10 = arith.constant 0 : index
    %c0_11 = arith.constant 0 : index
    %25 = vector.load %arg4[%c0_10, %c0_11] : memref<16x1xi32, #tpu.memory_space<vmem>>, vector<16x1xi32>
    %26 = vector.broadcast %25 : vector<16x1xi32> to vector<16x128xi32>
    %27 = arith.cmpi eq, %24, %26 : vector<16x128xi32>
    %28 = arith.select %27, %20, %2 : vector<16x128xi1>, vector<16x128xf32>
    %cst_12 = arith.constant 6.400000e+01 : f32
    %29 = vector.broadcast %cst_12 : f32 to vector<16x128xf32>
    %30 = arith.mulf %28, %29 : vector<16x128xf32>
    %c0_13 = arith.constant 0 : index
    %c0_14 = arith.constant 0 : index
    %31 = vector.load %arg5[%c0_13, %c0_14] : memref<16x128xf32, #tpu.memory_space<vmem>>, vector<16x128xf32>
    tpu.vector_store %arg5[%c0_13, %c0_14], %30 {strides = array<i32>} : memref<16x128xf32, #tpu.memory_space<vmem>>, vector<16x128xf32>,
    return
  }
  func.func @transform_0(%arg0: i32, %arg1: i32) -> (i32, i32) {
    %c0_i32 = arith.constant 0 : i32
    %c0_i32_0 = arith.constant 0 : i32
    return %arg0, %c0_i32 : i32, i32
  }
  func.func @transform_1(%arg0: i32, %arg1: i32) -> (i32, i32) {
    %c0_i32 = arith.constant 0 : i32
    %c0_i32_0 = arith.constant 0 : i32
    return %c0_i32, %arg1 : i32, i32
  }
  func.func @transform_2(%arg0: i32, %arg1: i32) -> (i32, i32) {
    %c0_i32 = arith.constant 0 : i32
    %c0_i32_0 = arith.constant 0 : i32
    return %arg0, %c0_i32 : i32, i32
  }
  func.func @transform_3(%arg0: i32, %arg1: i32) -> (i32, i32) {
    %c0_i32 = arith.constant 0 : i32
    return %arg0, %arg1 : i32, i32
  }
}

</mosaic_0001>

<bundles_post_ra>
// kernel: softmaxnet_forward.4
= control target key start
LH: loop header
LB: loop body
LE: loop exit
PB: predicated region body
PF: predicated region fallthrough
CT: control target
= control target key end

     0   :  { %s762_s0 = inlined_call_operand.vmem [shape: f32[128,128], index: 0, kind: input, shape index: {}]   ;;  %s763_s1 = inlined_call_operand.vmem [shape: bf16[128,128], index: 1, kind: output, shape index: {}]  }
   0x1   :  { %v392_v0 = vld [vmem:[%s762_s0 + $0x20] sm:$0xff]  ;;  %v397_v1 = vld [vmem:[%s762_s0 + $0x10] sm:$0xff]  ;;  %v413_v6 = vld [vmem:[%s762_s0 + $0x28] sm:$0xff] }
   0x2   :  { %v402_v2 = vld [vmem:[%s762_s0] sm:$0xff]  ;;  %v28_v3 = vmul.f32 %v392_v0, %v392_v0  ;;  %v26_v4 = vmul.f32 %v397_v1, %v397_v1  ;;  %v418_v7 = vld [vmem:[%s762_s0 + $0x18] sm:$0xff]  ;;  %v423_v8 = vld [vmem:[%s762_s0 + $0x8] sm:$0xff]  ;;  %v29_v9 = vmul.f32 %v413_v6, %v413_v6 }
   0x3   :  { %v24_v5 = vmul.f32 %v402_v2, %v402_v2  ;;  %v27_v10 = vmul.f32 %v418_v7, %v418_v7  ;;  %v25_v11 = vmul.f32 %v423_v8, %v423_v8  ;;  %v434_v12 = vld [vmem:[%s762_s0 + $0x40] sm:$0xff]  ;;  %v439_v13 = vld [vmem:[%s762_s0 + $0x38] sm:$0xff]  ;;  %v444_v14 = vld [vmem:[%s762_s0 + $0x30] sm:$0xff] }
   0x4   :  { %48 = vadd.xlane.f32.xlu2 %v28_v3  ;;  %44 = vadd.xlane.f32.xlu1 %v26_v4  ;;  %v32_v15 = vmul.f32 %v434_v12, %v434_v12  ;;  %v31_v16 = vmul.f32 %v439_v13, %v439_v13  ;;  %v30_v17 = vmul.f32 %v444_v14, %v444_v14  ;;  %v455_v18 = vld [vmem:[%s762_s0 + $0x58] sm:$0xff]  ;;  %v460_v19 = vld [vmem:[%s762_s0 + $0x50] sm:$0xff]  ;;  %v465_v20 = vld [vmem:[%s762_s0 + $0x48] sm:$0xff] }
   0x5   :  { %40 = vadd.xlane.f32.xlu0 %v24_v5  ;;  %v35_v21 = vmul.f32 %v455_v18, %v455_v18  ;;  %v34_v22 = vmul.f32 %v460_v19, %v460_v19  ;;  %v33_v23 = vmul.f32 %v465_v20, %v465_v20  ;;  %v476_v24 = vld [vmem:[%s762_s0 + $0x70] sm:$0xff]  ;;  %v481_v25 = vld [vmem:[%s762_s0 + $0x68] sm:$0xff]  ;;  %v486_v26 = vld [vmem:[%s762_s0 + $0x60] sm:$0xff] }
   0x6   :  { %v38_v27 = vmul.f32 %v476_v24, %v476_v24  ;;  %v37_v28 = vmul.f32 %v481_v25, %v481_v25  ;;  %v36_v29 = vmul.f32 %v486_v26, %v486_v26  ;;  %v497_v30 = vld [vmem:[%s762_s0 + $0x78] sm:$0xff] }
   0x7   :  { %v39_v31 = vmul.f32 %v497_v30, %v497_v30 }
   0xc   :  { %50 = vadd.xlane.f32.xlu2 %v29_v9  ;;  %46 = vadd.xlane.f32.xlu1 %v27_v10 }
   0xd   :  { %42 = vadd.xlane.f32.xlu0 %v25_v11 }
  0x14   :  { %56 = vadd.xlane.f32.xlu2 %v32_v15  ;;  %54 = vadd.xlane.f32.xlu1 %v31_v16 }
  0x15   :  { %52 = vadd.xlane.f32.xlu0 %v30_v17 }
  0x1c   :  { %62 = vadd.xlane.f32.xlu2 %v35_v21  ;;  %60 = vadd.xlane.f32.xlu1 %v34_v22 }
  0x1d   :  { %58 = vadd.xlane.f32.xlu0 %v33_v23 }
  0x24   :  { %68 = vadd.xlane.f32.xlu2 %v38_v27  ;;  %66 = vadd.xlane.f32.xlu1 %v37_v28 }
  0x25   :  { %64 = vadd.xlane.f32.xlu0 %v36_v29 }
  0x2d   :  { %70 = vadd.xlane.f32.xlu0 %v39_v31 }
  0x77   :  { %v49_v32 = vpop.xlane.xlu2 %48  ;;  %v45_v33 = vpop.xlane.xlu1 %44 }
  0x78   :  { %v76_v34 = vmax.f32 %v49_v32, 1e-24  ;;  %v501_v35 = vmax.f32 %v45_v33, 1e-24  ;;  %v41_v36 = vpop.xlane.xlu0 %40 }
  0x79   :  { %v503_v37 = vmax.f32 %v41_v36, 1e-24 }
  0x7a   :  { %347 = vrsqrt.f32 %v76_v34  ;;  %vm134_vm0 = vweird.f32 %v76_v34  ;;  %vm114_vm1 = vweird.f32 %v501_v35 }
  0x7b   :  { %349 = vrsqrt.f32 %v501_v35  ;;  %vm94_vm3 = vweird.f32 %v503_v37 }
  0x7c   :  { %351 = vrsqrt.f32 %v503_v37 }
  0x7f   :  { %v51_v38 = vpop.xlane.xlu2 %50  ;;  %v47_v39 = vpop.xlane.xlu1 %46 }
  0x80   :  { %v507_v40 = vpop.eup %347  ;;  %v509_v41 = vmax.f32 %v51_v38, 1e-24  ;;  %v511_v42 = vmax.f32 %v47_v39, 1e-24  ;;  %v43_v43 = vpop.xlane.xlu0 %42 }
  0x81   :  { %v513_v44 = vpop.eup %349  ;;  %v129_v45 = vmul.f32 %v507_v40, %v76_v34  ;;  %v516_v46 = vmax.f32 %v43_v43, 1e-24  ;;  %vm135_vm2 = vweird.f32 %v507_v40 }
  0x82   :  { %v518_v47 = vpop.eup %351  ;;  %v109_v48 = vmul.f32 %v513_v44, %v501_v35  ;;  %353 = vrsqrt.f32 %v509_v41  ;;  %vm115_vm4 = vweird.f32 %v513_v44  ;;  %vm144_vm5 = vweird.f32 %v509_v41  ;;  %vm566_vm10 = vmor %vm134_vm0, %vm135_vm2 }
  0x83   :  { %v130_v49 = vmul.f32 %v507_v40, %v129_v45  ;;  %v89_v50 = vmul.f32 %v518_v47, %v503_v37  ;;  %355 = vrsqrt.f32 %v511_v42  ;;  %vm95_vm6 = vweird.f32 %v518_v47  ;;  %vm582_vm12 = vmor %vm114_vm1, %vm115_vm4 }
  0x84   :  { %v110_v51 = vmul.f32 %v513_v44, %v109_v48  ;;  %357 = vrsqrt.f32 %v516_v46  ;;  %vm124_vm7 = vweird.f32 %v511_v42  ;;  %vm104_vm8 = vweird.f32 %v516_v46  ;;  %vm597_vm13 = vmor %vm94_vm3, %vm95_vm6 }
  0x85   :  { %v131_v52 = vmul.f32 0.5, %v130_v49  ;;  %v90_v53 = vmul.f32 %v518_v47, %v89_v50 }
  0x86   :  { %v111_v54 = vmul.f32 0.5, %v110_v51 }
  0x87   :  { %v91_v55 = vmul.f32 0.5, %v90_v53  ;;  %v57_v56 = vpop.xlane.xlu2 %56  ;;  %v55_v57 = vpop.xlane.xlu1 %54  ;;  %v132_v59 = vsub.f32 1.5, %v131_v52 }
  0x88   :  { %v530_v58 = vpop.eup %353  ;;  %v533_v60 = vmax.f32 %v57_v56, 1e-24  ;;  %v53_v61 = vpop.xlane.xlu0 %52  ;;  %v112_v63 = vsub.f32 1.5, %v111_v54  ;;  %v546_v10 = vmax.f32 %v55_v57, 1e-24 }
  0x89   :  { %v535_v62 = vpop.eup %355  ;;  %v139_v3 = vmul.f32 %v530_v58, %v509_v41  ;;  %v92_v5 = vsub.f32 1.5, %v91_v55  ;;  %v133_v16 = vmul.f32 %v507_v40, %v132_v59  ;;  %vm145_vm9 = vweird.f32 %v530_v58 }
  0x8a   :  { %v541_v4 = vpop.eup %357  ;;  %v119_v9 = vmul.f32 %v535_v62, %v511_v42  ;;  %359 = vrsqrt.f32 %v533_v60  ;;  %v113_v21 = vmul.f32 %v513_v44, %v112_v63  ;;  %vm125_vm11 = vweird.f32 %v535_v62  ;;  %vm146_vm15 = vmor %vm144_vm5, %vm145_vm9 }
  0x8b   :  { %v140_v11 = vmul.f32 %v530_v58, %v139_v3  ;;  %v99_v15 = vmul.f32 %v541_v4, %v516_v46  ;;  %v93_v27 = vmul.f32 %v518_v47, %v92_v5  ;;  %361 = vrsqrt.f32 %v546_v10  ;;  %vm126_vm0 = vmor %vm124_vm7, %vm125_vm11 }
  0x8c   :  { %v120_v17 = vmul.f32 %v535_v62, %v119_v9  ;;  %v571_v33 = vmax.f32 %v53_v61, 1e-24  ;;  %v137_v43 = vsel %vm566_vm10, %v507_v40, %v133_v16  ;;  %v117_v51 = vsel %vm582_vm12, %v513_v44, %v113_v21 }
  0x8d   :  { %v141_v22 = vmul.f32 0.5, %v140_v11  ;;  %v100_v23 = vmul.f32 %v541_v4, %v99_v15  ;;  %vm105_vm14 = vweird.f32 %v541_v4  ;;  %v97_v53 = vsel %vm597_vm13, %v518_v47, %v93_v27 }
  0x8e   :  { %v121_v28 = vmul.f32 0.5, %v120_v17  ;;  %363 = vrsqrt.f32 %v571_v33  ;;  %v252_v54 = vmul.f32 %v137_v43, %v392_v0  ;;  %v250_v56 = vmul.f32 %v117_v51, %v397_v1  ;;  %vm106_vm1 = vmor %vm104_vm8, %vm105_vm14 }
  0x8f   :  { %v142_v31 = vsub.f32 1.5, %v141_v22  ;;  %v101_v32 = vmul.f32 0.5, %v100_v23  ;;  %v63_v36 = vpop.xlane.xlu2 %62  ;;  %v61_v38 = vpop.xlane.xlu1 %60  ;;  %v248_v0 = vmul.f32 %v97_v53, %v402_v2  ;;  %vm164_vm2 = vweird.f32 %v546_v10 }
  0x90   :  { %v573_v39 = vpop.eup %359  ;;  %v122_v45 = vsub.f32 1.5, %v121_v28  ;;  %v586_v48 = vmax.f32 %v63_v36, 1e-24  ;;  %v588_v49 = vmax.f32 %v61_v38, 1e-24  ;;  %v59_v50 = vpop.xlane.xlu0 %58  ;;  %vm154_vm3 = vweird.f32 %v571_v33 }
  0x91   :  { %v143_v40 = vmul.f32 %v530_v58, %v142_v31  ;;  %v102_v52 = vsub.f32 1.5, %v101_v32  ;;  %v169_v44 = vmul.f32 %v573_v39, %v533_v60  ;;  %v622_v41 = vpop.eup %361  ;;  %v639_v63 = vmax.f32 %v59_v50, 1e-24 }
  0x92   :  { %v123_v37 = vmul.f32 %v535_v62, %v122_v45  ;;  %365 = vrsqrt.f32 %v586_v48  ;;  %v159_v1 = vmul.f32 %v622_v41, %v546_v10  ;;  %vm174_vm4 = vweird.f32 %v533_v60 }
  0x93   :  { %v147_v55 = vsel %vm146_vm15, %v530_v58, %v143_v40  ;;  %v103_v47 = vmul.f32 %v541_v4, %v102_v52  ;;  %367 = vrsqrt.f32 %v588_v49  ;;  %vm175_vm5 = vweird.f32 %v573_v39 }
  0x94   :  { %v253_v57 = vmul.f32 %v147_v55, %v413_v6  ;;  %v127_v59 = vsel %vm126_vm0, %v535_v62, %v123_v37  ;;  %v170_v62 = vmul.f32 %v573_v39, %v169_v44  ;;  %v160_v3 = vmul.f32 %v622_v41, %v159_v1  ;;  %v642_v9 = vpop.eup %363 }
  0x95   :  { %v251_v42 = vmul.f32 %v127_v59, %v418_v7  ;;  %v107_v58 = vsel %vm106_vm1, %v541_v4, %v103_v47  ;;  %369 = vrsqrt.f32 %v639_v63  ;;  %v149_v15 = vmul.f32 %v642_v9, %v571_v33  ;;  %vm722_vm1 = vmor %vm174_vm4, %vm175_vm5 }
  0x96   :  { %v313_v61 = vpack.c.bf16 %v253_v57, %v252_v54  ;;  %v249_v6 = vmul.f32 %v107_v58, %v423_v8  ;;  %v161_v11 = vmul.f32 0.5, %v160_v3  ;;  %v171_v21 = vmul.f32 0.5, %v170_v62 }
  0x97   :  { %v308_v46 = vpack.c.bf16 %v251_v42, %v250_v56  ;;  %v69_v5 = vpop.xlane.xlu2 %68  ;;  %v67_v16 = vpop.xlane.xlu1 %66  ;;  %vm165_vm6 = vweird.f32 %v622_v41  ;;  %v150_v27 = vmul.f32 %v642_v9, %v149_v15  ;;  %vm204_vm7 = vweird.f32 %v586_v48 }
  0x98   :  { %341 = vst [vmem:[%s763_s1 + $0x10] sm:$0xff] %v313_v61   ;;  %v303_v2 = vpack.c.bf16 %v249_v6, %v248_v0  ;;  %v648_v7 = vmax.f32 %v69_v5, 1e-24  ;;  %v65_v8 = vpop.xlane.xlu0 %64  ;;  %v366_v4 = vpop.eup %365  ;;  %v162_v23 = vsub.f32 1.5, %v161_v11  ;;  %vm194_vm8 = vweird.f32 %v588_v49  ;;  %vm680_vm9 = vmor %vm164_vm2, %vm165_vm6 }
  0x99   :  { %340 = vst [vmem:[%s763_s1 + $0x8] sm:$0xff] %v308_v46   ;;  %v656_v17 = vpop.eup %367  ;;  %v199_v22 = vmul.f32 %v366_v4, %v586_v48  ;;  %v672_v31 = vmax.f32 %v67_v16, 1e-24  ;;  %v151_v36 = vmul.f32 0.5, %v150_v27  ;;  %v676_v43 = vmax.f32 %v65_v8, 1e-24 }
  0x9a   :  { %304 = vst [vmem:[%s763_s1] sm:$0xff] %v303_v2   ;;  %371 = vrsqrt.f32 %v648_v7  ;;  %v189_v28 = vmul.f32 %v656_v17, %v588_v49  ;;  %v163_v32 = vmul.f32 %v622_v41, %v162_v23  ;;  %v172_v45 = vsub.f32 1.5, %v171_v21 }
  0x9b   :  { %v200_v29 = vmul.f32 %v366_v4, %v199_v22  ;;  %v370_v34 = vpop.eup %369  ;;  %vm155_vm10 = vweird.f32 %v642_v9  ;;  %373 = vrsqrt.f32 %v672_v31  ;;  %v152_v40 = vsub.f32 1.5, %v151_v36 }
  0x9c   :  { %v190_v38 = vmul.f32 %v656_v17, %v189_v28  ;;  %v167_v35 = vsel %vm680_vm9, %v622_v41, %v163_v32  ;;  %v179_v53 = vmul.f32 %v370_v34, %v639_v63  ;;  %vm205_vm11 = vweird.f32 %v366_v4  ;;  %vm156_vm13 = vmor %vm154_vm3, %vm155_vm10 }
  0x9d   :  { %v201_v51 = vmul.f32 0.5, %v200_v29  ;;  %vm195_vm12 = vweird.f32 %v656_v17  ;;  %375 = vrsqrt.f32 %v676_v43  ;;  %v153_v54 = vmul.f32 %v642_v9, %v152_v40  ;;  %vm206_vm14 = vmor %vm204_vm7, %vm205_vm11 }
  0x9e   :  { %v191_v52 = vmul.f32 0.5, %v190_v38  ;;  %v180_v47 = vmul.f32 %v370_v34, %v179_v53  ;;  %v173_v56 = vmul.f32 %v573_v39, %v172_v45  ;;  %v255_v57 = vmul.f32 %v167_v35, %v439_v13  ;;  %vm196_vm15 = vmor %vm194_vm8, %vm195_vm12 }
  0x9f   :  { %v202_v10 = vsub.f32 1.5, %v201_v51  ;;  %v157_v42 = vsel %vm156_vm13, %v642_v9, %v153_v54  ;;  %vm185_vm0 = vweird.f32 %v370_v34  ;;  %vm184_vm2 = vweird.f32 %v639_v63 }
  0xa0   :  { %v690_v37 = vpop.eup %371  ;;  %v71_v44 = vpop.xlane.xlu0 %70  ;;  %v192_v55 = vsub.f32 1.5, %v191_v52  ;;  %v181_v1 = vmul.f32 0.5, %v180_v47  ;;  %v254_v13 = vmul.f32 %v157_v42, %v444_v14  ;;  %v177_v9 = vsel %vm722_vm1, %v573_v39, %v173_v56  ;;  %vm186_vm3 = vmor %vm184_vm2, %vm185_vm0 }
  0xa1   :  { %v229_v41 = vmul.f32 %v690_v37, %v648_v7  ;;  %v203_v59 = vmul.f32 %v366_v4, %v202_v10  ;;  %v703_v0 = vmax.f32 %v71_v44, 1e-24  ;;  %v374_v6 = vpop.eup %373  ;;  %v256_v16 = vmul.f32 %v177_v9, %v434_v12 }
  0xa2   :  { %v193_v58 = vmul.f32 %v656_v17, %v192_v55  ;;  %v182_v46 = vsub.f32 1.5, %v181_v1  ;;  %v318_v5 = vpack.c.bf16 %v255_v57, %v254_v13  ;;  %vm224_vm4 = vweird.f32 %v672_v31 }
  0xa3   :  { %v230_v61 = vmul.f32 %v690_v37, %v229_v41  ;;  %v207_v62 = vsel %vm206_vm14, %v366_v4, %v203_v59  ;;  %377 = vrsqrt.f32 %v703_v0  ;;  %v376_v3 = vpop.eup %375  ;;  %vm225_vm5 = vweird.f32 %v374_v6 }
  0xa4   :  { %v259_v33 = vmul.f32 %v207_v62, %v455_v18  ;;  %v197_v48 = vsel %vm196_vm15, %v656_v17, %v193_v58  ;;  %v219_v18 = vmul.f32 %v374_v6, %v672_v31  ;;  %v183_v2 = vmul.f32 %v370_v34, %v182_v46  ;;  %342 = vst [vmem:[%s763_s1 + $0x18] sm:$0xff] %v318_v5   ;;  %vm226_vm9 = vmor %vm224_vm4, %vm225_vm5 }
  0xa5   :  { %v258_v49 = vmul.f32 %v197_v48, %v460_v19  ;;  %v231_v8 = vmul.f32 0.5, %v230_v61  ;;  %v209_v4 = vmul.f32 %v376_v3, %v676_v43  ;;  %vm215_vm6 = vweird.f32 %v376_v3 }
  0xa6   :  { %v220_v11 = vmul.f32 %v374_v6, %v219_v18  ;;  %v187_v19 = vsel %vm186_vm3, %v370_v34, %v183_v2  ;;  %vm234_vm7 = vweird.f32 %v648_v7  ;;  %vm235_vm8 = vweird.f32 %v690_v37 }
  0xa7   :  { %v328_v60 = vpack.c.bf16 %v259_v33, %v258_v49  ;;  %v210_v15 = vmul.f32 %v376_v3, %v209_v4  ;;  %v257_v39 = vmul.f32 %v187_v19, %v465_v20  ;;  %v232_v21 = vsub.f32 1.5, %v231_v8  ;;  %vm236_vm13 = vmor %vm234_vm7, %vm235_vm8 }
  0xa8   :  { %v221_v17 = vmul.f32 0.5, %v220_v11  ;;  %vm214_vm10 = vweird.f32 %v676_v43  ;;  %vm244_vm14 = vweird.f32 %v703_v0 }
  0xa9   :  { %v378_v63 = vpop.eup %377  ;;  %344 = vst [vmem:[%s763_s1 + $0x28] sm:$0xff] %v328_v60   ;;  %v211_v22 = vmul.f32 0.5, %v210_v15  ;;  %v323_v27 = vpack.c.bf16 %v257_v39, %v256_v16  ;;  %v233_v20 = vmul.f32 %v690_v37, %v232_v21  ;;  %vm216_vm11 = vmor %vm214_vm10, %vm215_vm6 }
  0xaa   :  { %v239_v23 = vmul.f32 %v378_v63, %v703_v0  ;;  %v222_v28 = vsub.f32 1.5, %v221_v17  ;;  %vm245_vm12 = vweird.f32 %v378_v63 }
  0xab   :  { %v212_v29 = vsub.f32 1.5, %v211_v22  ;;  %343 = vst [vmem:[%s763_s1 + $0x20] sm:$0xff] %v323_v27   ;;  %v237_v51 = vsel %vm236_vm13, %v690_v37, %v233_v20  ;;  %vm246_vm15 = vmor %vm244_vm14, %vm245_vm12 }
  0xac   :  { %v240_v32 = vmul.f32 %v378_v63, %v239_v23  ;;  %v223_v12 = vmul.f32 %v374_v6, %v222_v28  ;;  %v262_v43 = vmul.f32 %v237_v51, %v476_v24 }
  0xad   :  { %v213_v36 = vmul.f32 %v376_v3, %v212_v29 }
  0xae   :  { %v241_v31 = vmul.f32 0.5, %v240_v32  ;;  %v227_v38 = vsel %vm226_vm9, %v374_v6, %v223_v12 }
  0xaf   :  { %v261_v34 = vmul.f32 %v227_v38, %v481_v25  ;;  %v217_v45 = vsel %vm216_vm11, %v376_v3, %v213_v36 }
  0xb0   :  { %v242_v50 = vsub.f32 1.5, %v241_v31  ;;  %v260_v7 = vmul.f32 %v217_v45, %v486_v26 }
  0xb2   :  { %v243_v35 = vmul.f32 %v378_v63, %v242_v50  ;;  %v333_v40 = vpack.c.bf16 %v261_v34, %v260_v7 }
  0xb4   :  { %v247_v52 = vsel %vm246_vm15, %v378_v63, %v243_v35  ;;  %345 = vst [vmem:[%s763_s1 + $0x30] sm:$0xff] %v333_v40  }
  0xb5   :  { %v263_v25 = vmul.f32 %v247_v52, %v497_v30 }
  0xb7   :  { %v338_v53 = vpack.c.bf16 %v263_v25, %v262_v43 }
  0xb9   :  { %346 = vst [vmem:[%s763_s1 + $0x38] sm:$0xff] %v338_v53  }

// kernel: softmaxnet_forward.5
= control target key start
LH: loop header
LB: loop body
LE: loop exit
PB: predicated region body
PF: predicated region fallthrough
CT: control target
= control target key end

     0   :  { %v222_v2 = vmov 0   ;;  %v145_v29 = vlaneseq  ;;  %s282_s1 = inlined_call_operand.vmem [shape: bf16[128,128], index: 1, kind: input, shape index: {}]   ;;  %s283_s2 = inlined_call_operand.vmem [shape: s32[16,1], index: 2, kind: input, shape index: {}]   ;;  %s284_s0 = inlined_call_operand.vmem [shape: bf16[16,128], index: 0, kind: input, shape index: {}]   ;;  %s285_s3 = inlined_call_operand.vmem [shape: f32[16,128], index: 3, kind: output, shape index: {}]  }
   0x1   :  { %v215_v0 = vld [vmem:[%s282_s1 + $0x38] sm:$0xff]  ;;  %v214_v1 = vld [vmem:[%s282_s1 + $0x30] sm:$0xff]  ;;  %217 = vset.pattern.permute.xlu0 %v222_v2  ;;  %v149_v3 = vld [vmem:[%s283_s2] sm:$0xff] }
   0x2   :  { %86 = vmatpush.bf16.msra.mxu0 %v215_v0  ;;  %152 = vperm.xlu0 %217, %v149_v3   ;;  %v213_v4 = vld [vmem:[%s282_s1 + $0x28] sm:$0xff]  ;;  %v212_v6 = vld [vmem:[%s282_s1 + $0x20] sm:$0xff]  ;;  %v211_v7 = vld [vmem:[%s282_s1 + $0x18] sm:$0xff]  ;;  %v146_v35 = vand.u32 127, %v145_v29 }
   0x3   :  { %v150_v5 = vld [vmem:[%s283_s2 + $0x8] sm:$0xff]  ;;  %v210_v8 = vld [vmem:[%s282_s1 + $0x10] sm:$0xff]  ;;  %v208_v10 = vld [vmem:[%s282_s1] sm:$0xff] }
   0x4   :  { %v209_v9 = vld [vmem:[%s282_s1 + $0x8] sm:$0xff]  ;;  %v207_v11 = vld [vmem:[%s284_s0] sm:$0xff] }
   0x6   :  { %87 = vmatpush.bf16.msra.mxu0 %v214_v1 }
   0xa   :  { %88 = vmatpush.bf16.msra.mxu0 %v213_v4  ;;  %155 = vperm.xlu0 %217, %v150_v5  }
   0xe   :  { %89 = vmatpush.bf16.msra.mxu0 %v212_v6 }
  0x12   :  { %90 = vmatpush.bf16.msra.mxu0 %v211_v7 }
  0x16   :  { %91 = vmatpush.bf16.msra.mxu0 %v210_v8 }
  0x1a   :  { %92 = vmatpush.bf16.msra.mxu0 %v209_v9 }
  0x1e   :  { %93 = vmatpush.bf16.msra.mxu0 %v208_v10 }
  0x21   :  { %94 = vmatmul.bf16.vlgmr.msra.gmra.mxu0 %v207_v11 }
  0x74   :  { %v153_v37 = vpop.permute.xlu0 %152 }
  0x75   :  { %vm157_vm2 = vcmp.eq.s32.totalorder %v146_v35, %v153_v37 }
  0x7c   :  { %v156_v54 = vpop.permute.xlu0 %155 }
  0x7d   :  { %vm158_vm7 = vcmp.eq.s32.totalorder %v146_v35, %v156_v54 }
  0x9e   :  { %v95_v12 = vpop.f32.mrf.mxu0 }
  0x9f   :  { %v100_v13 = vmul.f32 %v95_v12, %v95_v12  ;;  %v132_v39 = vmul.f32 0.87758255, %v95_v12  ;;  %v205_v42 = vadd.f32 -0.23971277, %v95_v12  ;;  %vm138_vm3 = vcmp.gt.f32.partialorder %v95_v12, -0.87758255 }
  0xa1   :  { %v102_v14 = vsub.f32 1.0, %v100_v13 }
  0xa3   :  { %v104_v15 = vmax.f32 %v102_v14, 0.0 }
  0xa5   :  { %v106_v16 = vmin.f32 %v104_v15, 1.0 }
  0xa6   :  { %v97_v17 = vpop.f32.mrf.mxu0 }
  0xa7   :  { %218 = vrsqrt.f32 %v106_v16  ;;  %v101_v18 = vmul.f32 %v97_v17, %v97_v17  ;;  %vm115_vm0 = vcmp.eq.f32.partialorder %v106_v16, inf  ;;  %v118_v33 = vand.u32 2147483648, %v106_v16 }
  0xa8   :  { %vm117_vm1 = vcmp.eq.f32.partialorder %v106_v16, 0.0  ;;  %v133_v52 = vmul.f32 0.87758255, %v97_v17  ;;  %v206_v56 = vadd.f32 -0.23971277, %v97_v17 }
  0xa9   :  { %v103_v19 = vsub.f32 1.0, %v101_v18  ;;  %vm139_vm6 = vcmp.gt.f32.partialorder %v97_v17, -0.87758255 }
  0xab   :  { %v105_v20 = vmax.f32 %v103_v19, 0.0 }
  0xad   :  { %v219_v21 = vpop.eup %218  ;;  %v107_v22 = vmin.f32 %v105_v20, 1.0 }
  0xae   :  { %v109_v23 = vmul.f32 %v219_v21, %v106_v16 }
  0xaf   :  { %220 = vrsqrt.f32 %v107_v22  ;;  %vm127_vm4 = vcmp.eq.f32.partialorder %v107_v22, inf  ;;  %v130_v47 = vand.u32 2147483648, %v107_v22  ;;  %vm129_vm5 = vcmp.eq.f32.partialorder %v107_v22, 0.0 }
  0xb0   :  { %v110_v24 = vmul.f32 %v219_v21, %v109_v23 }
  0xb2   :  { %v111_v25 = vmul.f32 0.5, %v110_v24 }
  0xb4   :  { %v112_v26 = vsub.f32 1.5, %v111_v25 }
  0xb5   :  { %v221_v27 = vpop.eup %220 }
  0xb6   :  { %v121_v28 = vmul.f32 %v221_v27, %v107_v22  ;;  %v113_v30 = vmul.f32 %v219_v21, %v112_v26 }
  0xb8   :  { %v122_v31 = vmul.f32 %v221_v27, %v121_v28  ;;  %v114_v32 = vmul.f32 %v113_v30, %v106_v16 }
  0xba   :  { %v123_v34 = vmul.f32 0.5, %v122_v31  ;;  %v116_v36 = vsel %vm115_vm0, %v106_v16, %v114_v32 }
  0xbb   :  { %v119_v38 = vsel %vm117_vm1, %v118_v33, %v116_v36 }
  0xbc   :  { %v124_v40 = vsub.f32 1.5, %v123_v34  ;;  %v134_v41 = vmul.f32 0.47942555, %v119_v38 }
  0xbe   :  { %v125_v43 = vmul.f32 %v221_v27, %v124_v40  ;;  %v136_v44 = vsub.f32 %v132_v39, %v134_v41 }
  0xc0   :  { %v126_v45 = vmul.f32 %v125_v43, %v107_v22  ;;  %v142_v46 = vsel %vm138_vm3, %v136_v44, %v205_v42 }
  0xc1   :  { %v159_v48 = vsel %vm157_vm2, %v142_v46, %v95_v12 }
  0xc2   :  { %v128_v49 = vsel %vm127_vm4, %v107_v22, %v126_v45  ;;  %v161_v50 = vmul.f32 64.0, %v159_v48 }
  0xc3   :  { %v131_v51 = vsel %vm129_vm5, %v130_v47, %v128_v49 }
  0xc4   :  { %v135_v53 = vmul.f32 0.47942555, %v131_v51  ;;  %163 = vst [vmem:[%s285_s3] sm:$0xff] %v161_v50 }
  0xc6   :  { %v137_v55 = vsub.f32 %v133_v52, %v135_v53 }
  0xc8   :  { %v143_v57 = vsel %vm139_vm6, %v137_v55, %v206_v56 }
  0xc9   :  { %v160_v58 = vsel %vm158_vm7, %v143_v57, %v97_v17 }
  0xca   :  { %v162_v59 = vmul.f32 64.0, %v160_v58 }
  0xcc   :  { %164 = vst [vmem:[%s285_s3 + $0x8] sm:$0xff] %v162_v59 }

// kernel: softmaxnet_forward.3
= control target key start
LH: loop header
LB: loop body
LE: loop exit
PB: predicated region body
PF: predicated region fallthrough
CT: control target
= control target key end

     0   :  { %s1025_s12 = smov 0   ;;  %s1027_s13 = smov 0   ;;  %s1142_s0 = inlined_call_operand.vmem [shape: bf16[16,1024], index: 0, kind: input, shape index: {}]   ;;  %s1143_s1 = inlined_call_operand.vmem [shape: bf16[1024,128], index: 1, kind: input, shape index: {}]   ;;  %s1144_s2 = inlined_call_operand.vmem [shape: f32[1,128], index: 2, kind: input, shape index: {}]   ;;  %s1145_s3 = inlined_call_operand.vmem [shape: bf16[16,128], index: 3, kind: output, shape index: {}]  }
   0x1   :  { %s1029_s14 = smov 0   ;;  %s1031_s15 = smov 0  }
   0x2   :  { %s1033_s16 = smov 0  }
   0x3 LB: > { %s22_s17 = sadd.s32 1, %s998_s15  ;;  %p41_p1 = scmp.ne.s32.totalorder %s990_s13, %s986_s12  ;;  %s1002_s16 = sphi %s1033_s16, %s13_s16   ;;  %s998_s15 = sphi %s1031_s15, %s1149_s15   ;;  %s994_s14 = sphi %s1029_s14, %s1148_s14   ;;  %s990_s13 = sphi %s1027_s13, %s1147_s13   ;;  %s986_s12 = sphi %s1025_s12, %s1146_s12  }
   0x4   : > { %p23_p0 = scmp.ge.s32.totalorder %s22_s17, 2  ;;  %p42_p2 = scmp.eq.s32.totalorder %s1002_s16, 0 }
   0x5   : > { %s34_s19 = sadd.s32 1, %s990_s13  ;;  %p718_p5 = scmp.ge.s32.totalorder %s1002_s16, 2 }
   0x6   : > { %s1151_s17 = smov (%p23_p0, %s22_s17), 0  ;;  %p43_p3 = por %p42_p2, %p41_p1 }
   0x7   : > { %s30_s18 = ssub.s32 %s998_s15, %s1151_s17  ;;  %143 = sbr.rel (%p718_p5) target bundleno = 20 (0x14), region = 20 }
   0x8   : > { %p32_p4 = scmp.eq.s32.totalorder %s30_s18, 0 }
   0xa   : > { %s1060_s20 = scalar_select %p32_p4, %s990_s13, %s34_s19  }
   0xc   : > { %146 = sbr.rel (!%p43_p3) target bundleno = 20 (0x14), region = 24  ;;  %s148_s21 = sand.u32 (%p43_p3), 1, %s990_s13  }
   0xd   : > { %s876_s22 = sshll.u32 (%p43_p3), %s998_s15, 4  ;;  %s719_s23 = sshll.u32 (%p43_p3), %s148_s21, 5 }
   0xe   : > { %s156_s26 = scalar_lea.vmem (%p43_p3), %s1142_s0, %s876_s22  ;;  %s150_s27 = scalar_lea.vmem (%p43_p3), [#allocation3], %s719_s23 }
   0xf   : > { %v169_v0 = vld [vmem:[%s156_s26] sm:$0xff] (%p43_p3)  ;;  %v171_v1 = vld [vmem:[%s156_s26 + $0x8] sm:$0xff] (%p43_p3) }
  0x10   : > { %v173_v2 = vld [vmem:[%s156_s26 + $0x20] sm:$0xff] (%p43_p3)  ;;  %170 = vst [vmem:[%s150_s27] sm:$0xff] (%p43_p3), %v169_v0  ;;  %v175_v3 = vld [vmem:[%s156_s26 + $0x28] sm:$0xff] (%p43_p3) }
  0x11   : > { %172 = vst [vmem:[%s150_s27 + $0x8] sm:$0xff] %v171_v1 }
  0x12   : > { %174 = vst [vmem:[%s150_s27 + $0x10] sm:$0xff] %v173_v2 }
  0x13   : > { %176 = vst [vmem:[%s150_s27 + $0x18] sm:$0xff] %v175_v3 }
  0x14 PF: > { %p722_p6 = scmp.ge.s32.totalorder %s1002_s16, 1  ;;  %p190_p7 = scmp.lt.s32.totalorder %s1002_s16, 3 }
  0x16   : > { %p191_p8 = pnand %p722_p6, %p190_p7 }
  0x17   : > { %s197_s28 = sand.u32 (!%p191_p8), 1, %s986_s12   ;;  %s724_s29 = sshll.u32 (!%p191_p8), %s994_s14, 6 }
  0x18   : > { %194 = sbr.rel (%p191_p8) target bundleno = 373 (0x175), region = 51  ;;  %s723_s30 = sshll.u32 (!%p191_p8), %s197_s28, 5 }
  0x19   : > { %p228_p9 = scmp.lt.s32.totalorder (!%p191_p8), %s724_s29, 127  ;;  %s1077_s8 = scalar_lea.vmem (!%p191_p8), [#allocation3], %s723_s30 }
  0x1a   : > { %p726_p10 = scmp.ne.s32.totalorder (!%p191_p8), %s994_s14, 0 }
  0x1d   : > { %s1153_s29 = smov (!%p228_p9, %s724_s29), 127  ;;  %242 = sbr.rel (%p726_p10) target bundleno = 37 (0x25), region = 59 }
  0x1e   : > { %s725_s4 = sshll.u32 %s1153_s29, 2 }
  0x1f   : > { %s1075_s7 = scalar_lea.vmem %s1143_s1, %s725_s4 }
  0x22   : > { %v1004_v4 = vmov 0.0  }
  0x23   : > { %243 = vst [vmem:[#allocation2] sm:$0xff] %v1004_v4 }
  0x24   : > { %244 = vst [vmem:[#allocation2 + $0x8] sm:$0xff] %v1004_v4 }
  0x25 PF: > { %v888_v5 = vld [vmem:[%s1075_s7 + $0x38] sm:$0xff]  ;;  %v887_v9 = vld [vmem:[%s1075_s7 + $0x30] sm:$0xff]  ;;  %v886_v13 = vld [vmem:[%s1075_s7 + $0x28] sm:$0xff]  ;;  %p871_p11 = scmp.ne.s32.totalorder %s994_s14, 1 }
  0x26   : > { %v896_v6 = vld [vmem:[%s1075_s7 + $0x78] sm:$0xff]  ;;  %527 = vmatpush.bf16.msra.mxu0 %v888_v5  ;;  %v895_v10 = vld [vmem:[%s1075_s7 + $0x70] sm:$0xff]  ;;  %v894_v14 = vld [vmem:[%s1075_s7 + $0x68] sm:$0xff] }
  0x27   : > { %v904_v7 = vld [vmem:[%s1075_s7 + $0xb8] sm:$0xff]  ;;  %541 = vmatpush.bf16.msra.mxu1 %v896_v6  ;;  %v903_v11 = vld [vmem:[%s1075_s7 + $0xb0] sm:$0xff]  ;;  %v902_v15 = vld [vmem:[%s1075_s7 + $0xa8] sm:$0xff] }
  0x28   : > { %v912_v8 = vld [vmem:[%s1075_s7 + $0xf8] sm:$0xff]  ;;  %555 = vmatpush.bf16.msra.mxu2 %v904_v7  ;;  %v911_v12 = vld [vmem:[%s1075_s7 + $0xf0] sm:$0xff]  ;;  %v910_v16 = vld [vmem:[%s1075_s7 + $0xe8] sm:$0xff] }
  0x29   : > { %569 = vmatpush.bf16.msra.mxu3 %v912_v8  ;;  %v885_v17 = vld [vmem:[%s1075_s7 + $0x20] sm:$0xff]  ;;  %v884_v21 = vld [vmem:[%s1075_s7 + $0x18] sm:$0xff]  ;;  %v883_v25 = vld [vmem:[%s1075_s7 + $0x10] sm:$0xff] }
  0x2a   : > { %528 = vmatpush.bf16.msra.mxu0 %v887_v9  ;;  %v893_v18 = vld [vmem:[%s1075_s7 + $0x60] sm:$0xff]  ;;  %v892_v22 = vld [vmem:[%s1075_s7 + $0x58] sm:$0xff]  ;;  %v891_v26 = vld [vmem:[%s1075_s7 + $0x50] sm:$0xff] }
  0x2b   : > { %542 = vmatpush.bf16.msra.mxu1 %v895_v10  ;;  %v901_v19 = vld [vmem:[%s1075_s7 + $0xa0] sm:$0xff]  ;;  %v900_v23 = vld [vmem:[%s1075_s7 + $0x98] sm:$0xff]  ;;  %v899_v27 = vld [vmem:[%s1075_s7 + $0x90] sm:$0xff] }
  0x2c   : > { %556 = vmatpush.bf16.msra.mxu2 %v903_v11  ;;  %v909_v20 = vld [vmem:[%s1075_s7 + $0xe0] sm:$0xff]  ;;  %v908_v24 = vld [vmem:[%s1075_s7 + $0xd8] sm:$0xff]  ;;  %v907_v28 = vld [vmem:[%s1075_s7 + $0xd0] sm:$0xff] }
  0x2d   : > { %570 = vmatpush.bf16.msra.mxu3 %v911_v12  ;;  %v882_v29 = vld [vmem:[%s1075_s7 + $0x8] sm:$0xff]  ;;  %v881_v33 = vld [vmem:[%s1075_s7] sm:$0xff]  ;;  %v729_v37 = vld [vmem:[%s1077_s8] sm:$0xf] }
  0x2e   : > { %529 = vmatpush.bf16.msra.mxu0 %v886_v13  ;;  %v890_v30 = vld [vmem:[%s1075_s7 + $0x48] sm:$0xff]  ;;  %v889_v34 = vld [vmem:[%s1075_s7 + $0x40] sm:$0xff]  ;;  %v877_v39 = vld [vmem:[%s1077_s8 + $0x4] sm:$0xf] }
  0x2f   : > { %543 = vmatpush.bf16.msra.mxu1 %v894_v14  ;;  %v898_v31 = vld [vmem:[%s1075_s7 + $0x88] sm:$0xff]  ;;  %v897_v35 = vld [vmem:[%s1075_s7 + $0x80] sm:$0xff]  ;;  %v737_v41 = vld [vmem:[%s1077_s8 + $0x8] sm:$0xf] }
  0x30   : > { %557 = vmatpush.bf16.msra.mxu2 %v902_v15  ;;  %v906_v32 = vld [vmem:[%s1075_s7 + $0xc8] sm:$0xff]  ;;  %v905_v36 = vld [vmem:[%s1075_s7 + $0xc0] sm:$0xff]  ;;  %v878_v43 = vld [vmem:[%s1077_s8 + $0xc] sm:$0xf] }
  0x31   : > { %571 = vmatpush.bf16.msra.mxu3 %v910_v16  ;;  %v879_v38 = vld [vmem:[%s1077_s8 + $0xc] sm:$0xf0]  ;;  %v731_v40 = vld [vmem:[%s1077_s8 + $0x10] sm:$0xf0]  ;;  %v880_v42 = vld [vmem:[%s1077_s8 + $0x14] sm:$0xf0] }
  0x32   : > { %530 = vmatpush.bf16.msra.mxu0 %v885_v17  ;;  %v739_v44 = vld [vmem:[%s1077_s8 + $0x18] sm:$0xf0]  ;;  %v730_v45 = vor.u32 %v879_v38, %v729_v37  ;;  %v734_v46 = vor.u32 %v877_v39, %v731_v40  ;;  %v738_v47 = vor.u32 %v880_v42, %v737_v41  ;;  %v245_v55 = vld [vmem:[#allocation2] sm:$0xff] }
  0x33   : > { %544 = vmatpush.bf16.msra.mxu1 %v893_v18  ;;  %v742_v48 = vor.u32 %v878_v43, %v739_v44  ;;  %v246_v63 = vld [vmem:[#allocation2 + $0x8] sm:$0xff] }
  0x34   : > { %558 = vmatpush.bf16.msra.mxu2 %v901_v19 }
  0x35   : > { %572 = vmatpush.bf16.msra.mxu3 %v909_v20 }
  0x36   : > { %531 = vmatpush.bf16.msra.mxu0 %v884_v21 }
  0x37   : > { %545 = vmatpush.bf16.msra.mxu1 %v892_v22 }
  0x38   : > { %559 = vmatpush.bf16.msra.mxu2 %v900_v23 }
  0x39   : > { %573 = vmatpush.bf16.msra.mxu3 %v908_v24 }
  0x3a   : > { %532 = vmatpush.bf16.msra.mxu0 %v883_v25 }
  0x3b   : > { %546 = vmatpush.bf16.msra.mxu1 %v891_v26 }
  0x3c   : > { %560 = vmatpush.bf16.msra.mxu2 %v899_v27 }
  0x3d   : > { %574 = vmatpush.bf16.msra.mxu3 %v907_v28 }
  0x3e   : > { %533 = vmatpush.bf16.msra.mxu0 %v882_v29 }
  0x3f   : > { %547 = vmatpush.bf16.msra.mxu1 %v890_v30 }
  0x40   : > { %561 = vmatpush.bf16.msra.mxu2 %v898_v31 }
  0x41   : > { %575 = vmatpush.bf16.msra.mxu3 %v906_v32 }
  0x42   : > { %534 = vmatpush.bf16.msra.mxu0 %v881_v33 }
  0x43   : > { %548 = vmatpush.bf16.msra.mxu1 %v889_v34 }
  0x44   : > { %562 = vmatpush.bf16.msra.mxu2 %v897_v35 }
  0x45   : > { %576 = vmatpush.bf16.msra.mxu3 %v905_v36  ;;  %535 = vmatmul.bf16.vlgmr.msra.gmra.mxu0 %v730_v45 }
  0x46   : > { %549 = vmatmul.bf16.vlgmr.msra.gmra.mxu1 %v734_v46 }
  0x47   : > { %563 = vmatmul.bf16.vlgmr.msra.gmra.mxu2 %v738_v47 }
  0x48   : > { %577 = vmatmul.bf16.vlgmr.msra.gmra.mxu3 %v742_v48 }
  0xc2   : > { %v536_v49 = vpop.f32.mrf.mxu0 }
  0xc3   : > { %v550_v50 = vpop.f32.mrf.mxu1 }
  0xc4   : > { %v551_v51 = vadd.f32 %v550_v50, %v536_v49 }
  0xca   : > { %v564_v52 = vpop.f32.mrf.mxu2  ;;  %v538_v57 = vpop.f32.mrf.mxu0 }
  0xcb   : > { %v578_v53 = vpop.f32.mrf.mxu3  ;;  %v565_v54 = vadd.f32 %v564_v52, %v551_v51  ;;  %v552_v58 = vpop.f32.mrf.mxu1 }
  0xcc   : > { %v553_v60 = vadd.f32 %v552_v58, %v538_v57 }
  0xcd   : > { %v579_v56 = vadd.f32 %v578_v53, %v565_v54 }
  0xcf   : > { %v583_v59 = vadd.f32 %v579_v56, %v245_v55 }
  0xd1   : > { %585 = vst [vmem:[#allocation2] sm:$0xff] %v583_v59 }
  0xd2   : > { %v566_v61 = vpop.f32.mrf.mxu2 }
  0xd3   : > { %v567_v62 = vadd.f32 %v566_v61, %v553_v60  ;;  %v580_v0 = vpop.f32.mrf.mxu3 }
  0xd5   : > { %v581_v1 = vadd.f32 %v580_v0, %v567_v62  ;;  %590 = sbr.rel (%p871_p11) target bundleno = 373 (0x175), region = 63 }
  0xd7   : > { %v584_v2 = vadd.f32 %v581_v1, %v246_v63 }
  0xd9   : > { %586 = vst [vmem:[#allocation2 + $0x8] sm:$0xff] %v584_v2 }
  0xda   : > { %v591_v3 = vld [vmem:[#allocation2] sm:$0xff] }
  0xdb   : > { %v959_v4 = vld [vmem:[%s1144_s2] ss:$0 sm:$0xff] }
  0xdc   : > { %v597_v5 = vadd.f32 %v959_v4, %v591_v3 }
  0xde   : > { %v599_v7 = vmul.f32 %v597_v5, %v597_v5 }
  0xe0   : > { %v592_v6 = vld [vmem:[#allocation2 + $0x8] sm:$0xff]  ;;  %601 = vadd.xlane.f32.xlu0 %v599_v7 }
  0xe1   : > { %v598_v8 = vadd.f32 %v959_v4, %v592_v6 }
  0xe3   : > { %v600_v9 = vmul.f32 %v598_v8, %v598_v8 }
  0xe8   : > { %603 = vadd.xlane.f32.xlu0 %v600_v9 }
 0x153   : > { %v602_v10 = vpop.xlane.xlu0 %601 }
 0x154   : > { %v605_v11 = vmax.f32 %v602_v10, 1e-24 }
 0x156   : > { %960 = vrsqrt.f32 %v605_v11  ;;  %vm613_vm1 = vweird.f32 %v605_v11 }
 0x15b   : > { %v604_v12 = vpop.xlane.xlu0 %603 }
 0x15c   : > { %v961_v13 = vpop.eup %960  ;;  %v606_v14 = vmax.f32 %v604_v12, 1e-24 }
 0x15d   : > { %v608_v15 = vmul.f32 %v961_v13, %v605_v11  ;;  %vm614_vm0 = vweird.f32 %v961_v13 }
 0x15e   : > { %962 = vrsqrt.f32 %v606_v14  ;;  %vm615_vm3 = vmor %vm613_vm1, %vm614_vm0  ;;  %vm623_vm4 = vweird.f32 %v606_v14 }
 0x15f   : > { %v609_v16 = vmul.f32 %v961_v13, %v608_v15 }
 0x161   : > { %v610_v17 = vmul.f32 0.5, %v609_v16 }
 0x163   : > { %v611_v19 = vsub.f32 1.5, %v610_v17 }
 0x164   : > { %v963_v18 = vpop.eup %962 }
 0x165   : > { %v618_v20 = vmul.f32 %v963_v18, %v606_v14  ;;  %v612_v22 = vmul.f32 %v961_v13, %v611_v19  ;;  %vm624_vm2 = vweird.f32 %v963_v18 }
 0x166   : > { %vm625_vm5 = vmor %vm623_vm4, %vm624_vm2 }
 0x167   : > { %v619_v21 = vmul.f32 %v963_v18, %v618_v20  ;;  %v616_v25 = vsel %vm615_vm3, %v961_v13, %v612_v22 }
 0x168   : > { %v627_v28 = vmul.f32 %v616_v25, %v597_v5 }
 0x169   : > { %v620_v23 = vmul.f32 0.5, %v619_v21 }
 0x16b   : > { %v621_v24 = vsub.f32 1.5, %v620_v23 }
 0x16d   : > { %v622_v26 = vmul.f32 %v963_v18, %v621_v24 }
 0x16f   : > { %v626_v27 = vsel %vm625_vm5, %v963_v18, %v622_v26 }
 0x170   : > { %v628_v29 = vmul.f32 %v626_v27, %v598_v8 }
 0x172   : > { %v916_v30 = vpack.c.bf16 %v628_v29, %v627_v28 }
 0x174   : > { %917 = vst [vmem:[%s1145_s3] sm:$0xff] %v916_v30  }
 0x175 PF: > { %s13_s16 = sadd.s32 1, %s1002_s16   ;;  %s1146_s12 = smov %s990_s13 }
 0x176   : > { %p10_p12 = scmp.ge.s32.totalorder %s13_s16, 4   ;;  %s1147_s13 = smov %s1060_s20 }
 0x177   : > { %s1148_s14 = smov %s998_s15  ;;  %s1149_s15 = smov %s1151_s17 }
 0x178   :  { %12 = sbr.rel (!%p10_p12) target bundleno = 3 (0x3), region = 101 }

</bundles_post_ra>
